<compile_context>
chip_gen: v5e
topology: v5e:2x2
jax: 0.10.0
libtpu: 0.0.40
codegen_flags: <defaults>
</compile_context>

<pallas_src>
import math
import functools

import jax
import jax.numpy as jnp
from jax import lax
from jax.experimental import pallas as pl
from jax.experimental.pallas import tpu as pltpu


NEG_INF = -1e30   # finite "minus infinity": avoids (-inf)-(-inf)=NaN in the update


# --------------------------------------------------------------------------- #
# Hardware-aware configuration helpers                                        #
# --------------------------------------------------------------------------- #
def _pick_seq_tile(T, cap):
    """Largest tile <= cap that divides T (falls back to a single full-T block)."""
    if T <= cap:
        return T
    t = cap
    while t >= 8:
        if T % t == 0:
            return t
        t //= 2
    return T


def _attn_tile_cap():
    """256-wide attention tiles on v6e/v7x (256-wide MXU); 128 on v5e and older."""
    try:
        kind = jax.devices()[0].device_kind.lower()
    except Exception:
        kind = ""
    if any(v in kind for v in ("v2", "v3", "v4", "v5")):
        return 128
    return 256


def _vmem_limit_bytes():
    """Derive the scoped-VMEM budget from the chip instead of hard-coding 48 MiB."""
    try:
        cap = int(pltpu.get_tpu_info().vmem_capacity_bytes)
    except Exception:
        cap = 64 * 1024 * 1024          # conservative (v7x-sized) fallback
    # ~25% headroom for compiler-internal scratch; never ask for more than 100 MiB.
    return min(int(cap * 3 // 4), 100 * 1024 * 1024)


def _const_spec(block_shape, index_map):
    """BlockSpec for a block whose index never changes: single-buffer it.

    Double-buffering a constant block wastes VMEM with zero pipelining benefit
    (e.g. the (C,3C) QKV weight is 2*6*C^2 bytes when double-buffered).
    Falls back to a default BlockSpec if this Pallas build lacks pipeline_mode.
    """
    try:
        return pl.BlockSpec(block_shape, index_map, pipeline_mode=pl.Buffered(1))
    except Exception:
        return pl.BlockSpec(block_shape, index_map)


# --------------------------------------------------------------------------- #
# Kernel 1: fused QKV projection                                              #
# --------------------------------------------------------------------------- #
def _qkv_proj_kernel(x_ref, w_ref, b_ref, q_ref, k_ref, v_ref, *,
                     n_head, head_dim, scale):
    # x block: (1, tr, C); w: (C, 3C) bf16 (single-buffered); b: (1, 3C) f32
    x = x_ref[0].astype(jnp.bfloat16)                                   # (tr, C)
    qkv = jnp.dot(x, w_ref[...], preferred_element_type=jnp.float32)    # (tr, 3C)
    qkv = qkv + b_ref[...]
    tr = x.shape[0]
    C = n_head * head_dim

    def to_heads(m):   # (tr, C) -> (H, tr, D), matching torch .view(B,T,H,D).transpose(1,2)
        return m.reshape(tr, n_head, head_dim).transpose(1, 0, 2)

    q_ref[0] = (to_heads(qkv[:, :C]) * scale).astype(q_ref.dtype)       # pre-scaled Q
    k_ref[0] = to_heads(qkv[:, C:2 * C]).astype(k_ref.dtype)
    v_ref[0] = to_heads(qkv[:, 2 * C:]).astype(v_ref.dtype)


# --------------------------------------------------------------------------- #
# Kernel 2: flash attention on a triangular grid + fused output projection    #
# --------------------------------------------------------------------------- #
def _flash_attn_proj_kernel(qid_ref, kid_ref,                 # scalar-prefetch schedule
                            q_ref, k_ref, v_ref, wp_ref, bp_ref,
                            o_ref, m_sc, l_sc, acc_sc, *,
                            n_head, head_dim, tq, tk):
    t = pl.program_id(1)
    qi = qid_ref[t]
    ki = kid_ref[t]

    @pl.when(ki == 0)
    def _init():
        m_sc[...] = jnp.full_like(m_sc, NEG_INF)
        l_sc[...] = jnp.zeros_like(l_sc)
        acc_sc[...] = jnp.zeros_like(acc_sc)

    q = q_ref[0]   # (H, tq, D) bf16, pre-scaled by 1/sqrt(D)
    k = k_ref[0]   # (H, tk, D) bf16
    v = v_ref[0]   # (H, tk, D) bf16

    def flash_update(s):
        # s: (H, tq, tk) f32 unnormalized logits.  m/l scratch are 2-D (H, tq).
        m_prev = m_sc[...]
        m_new = jnp.maximum(m_prev, jnp.max(s, axis=-1))                 # (H, tq)
        alpha = jnp.exp(m_prev - m_new)                                  # (H, tq)
        p = jnp.exp(s - m_new[:, :, None])                               # (H, tq, tk)
        l_sc[...] = alpha * l_sc[...] + jnp.sum(p, axis=-1)
        acc_sc[...] = alpha[:, :, None] * acc_sc[...] + jnp.einsum(
            'hqk,hkd->hqd', p.astype(v.dtype), v,
            preferred_element_type=jnp.float32)                          # (H, tq, D)
        m_sc[...] = m_new

    # Interior tiles (strictly below the diagonal): no mask work at all.
    @pl.when(ki < qi)
    def _interior():
        s = jnp.einsum('hqd,hkd->hqk', q, k, preferred_element_type=jnp.float32)
        flash_update(s)

    # Diagonal tile: local causal mask, then finalize this q tile (normalize,
    # merge heads, fused output projection) and write the lane-dense output.
    @pl.when(ki == qi)
    def _diag_and_finalize():
        s = jnp.einsum('hqd,hkd->hqk', q, k, preferred_element_type=jnp.float32)
        # tq == tk and same tile offset => the mask is simply local row >= col.
        row = lax.broadcasted_iota(jnp.int32, (tq, tk), 0)
        col = lax.broadcasted_iota(jnp.int32, (tq, tk), 1)
        s = jnp.where((row >= col)[None, :, :], s, NEG_INF)
        flash_update(s)

        # Deferred softmax normalization via one EUP reciprocal on (H, tq).
        inv_l = pl.reciprocal(l_sc[...], approx=True)
        y = acc_sc[...] * inv_l[:, :, None]                              # (H, tq, D) f32
        y = y.transpose(1, 0, 2).reshape(tq, n_head * head_dim)          # (tq, C)
        out = jnp.dot(y.astype(jnp.bfloat16), wp_ref[...],
                      preferred_element_type=jnp.float32) + bp_ref[...]
        # TODO(synk): attn_dropout / resid_dropout implemented as identity (eval mode / p=0)
        o_ref[0] = out.astype(o_ref.dtype)


# --------------------------------------------------------------------------- #
# Wrapper                                                                     #
# --------------------------------------------------------------------------- #
def causal_self_attention(x, params, *, n_head):
    """x: (B, T, C) f32. params: (C,C) weights stored (in,out) + (1,C) biases."""
    B, T, C = x.shape
    assert C % n_head == 0
    D = C // n_head
    scale = 1.0 / math.sqrt(D)

    vmem_limit = _vmem_limit_bytes()

    # Fused QKV weight (C, 3C): one big MXU matmul instead of three.
    # (In a real deployment these would be stored pre-fused / pre-cast to bf16.)
    w_qkv = jnp.concatenate(
        [params["wq"], params["wk"], params["wv"]], axis=1).astype(jnp.bfloat16)
    b_qkv = jnp.concatenate(
        [params["bq"], params["bk"], params["bv"]], axis=1).astype(jnp.float32)
    w_p = params["wp"].astype(jnp.bfloat16)
    b_p = params["bp"].astype(jnp.float32)

    tr = _pick_seq_tile(T, 256)              # projection row tile
    tq = _pick_seq_tile(T, _attn_tile_cap()) # attention tiles: 256 on v6e/v7x, 128 on v5e
    tk = tq                                  # tq == tk => only the diagonal tile is masked

    # ---------------- kernel 1: fused QKV projection ---------------- #
    qkv_cost = pl.CostEstimate(
        flops=2 * B * T * C * (3 * C),
        transcendentals=0,
        bytes_accessed=B * T * C * 4 + C * 3 * C * 2 + 3 * C * 4 + 3 * B * T * C * 2,
    )
    q, k, v = pl.pallas_call(
        functools.partial(_qkv_proj_kernel, n_head=n_head, head_dim=D, scale=scale),
        out_shape=(jax.ShapeDtypeStruct((B, n_head, T, D), jnp.bfloat16),) * 3,
        grid_spec=pltpu.PrefetchScalarGridSpec(
            num_scalar_prefetch=0,
            grid=(B, T // tr),
            in_specs=[
                pl.BlockSpec((1, tr, C), lambda b, r: (b, r, 0)),
                _const_spec((C, 3 * C), lambda b, r: (0, 0)),   # single-buffered weight
                _const_spec((1, 3 * C), lambda b, r: (0, 0)),   # single-buffered bias
            ],
            out_specs=[pl.BlockSpec((1, n_head, tr, D), lambda b, r: (b, 0, r, 0))] * 3,
        ),
        compiler_params=pltpu.CompilerParams(
            dimension_semantics=("parallel", "parallel"),
            vmem_limit_bytes=vmem_limit),
        cost_estimate=qkv_cost,
    )(x, w_qkv, b_qkv)

    # ------- kernel 2: triangular-grid flash attention + fused out proj ------- #
    nq = T // tq
    # Flattened lower-triangular (qi, ki) schedule.  For each q tile the kv tiles
    # 0..qi run consecutively, so scratch init happens at ki == 0 and the output
    # block is written (and flushed) right after the diagonal tile.
    q_ids, k_ids = [], []
    for qi_ in range(nq):
        for ki_ in range(qi_ + 1):
            q_ids.append(qi_)
            k_ids.append(ki_)
    q_ids = jnp.asarray(q_ids, dtype=jnp.int32)
    k_ids = jnp.asarray(k_ids, dtype=jnp.int32)
    n_steps = int(q_ids.shape[0])            # nq*(nq+1)/2

    attn_cost = pl.CostEstimate(
        flops=2 * B * T * T * C + 2 * B * T * C * C,   # causal-halved QK^T+PV, + out proj
        transcendentals=B * n_head * T * T // 2,
        bytes_accessed=(B * T * C * 2                              # q (once per tile)
                        + 2 * B * T * C * 2 * max(1, (nq + 1) // 2)  # k/v triangular re-reads
                        + C * C * 2 + C * 4 + B * T * C * 4),
    )
    out = pl.pallas_call(
        functools.partial(_flash_attn_proj_kernel,
                          n_head=n_head, head_dim=D, tq=tq, tk=tk),
        out_shape=jax.ShapeDtypeStruct((B, T, C), x.dtype),
        grid_spec=pltpu.PrefetchScalarGridSpec(
            num_scalar_prefetch=2,           # (q_ids, k_ids) schedule in SMEM
            grid=(B, n_steps),
            in_specs=[
                pl.BlockSpec((1, n_head, tq, D),
                             lambda b, t, qid, kid: (b, 0, qid[t], 0)),
                pl.BlockSpec((1, n_head, tk, D),
                             lambda b, t, qid, kid: (b, 0, kid[t], 0)),
                pl.BlockSpec((1, n_head, tk, D),
                             lambda b, t, qid, kid: (b, 0, kid[t], 0)),
                _const_spec((C, C), lambda b, t, qid, kid: (0, 0)),   # wp single-buffered
                _const_spec((1, C), lambda b, t, qid, kid: (0, 0)),   # bp single-buffered
            ],
            out_specs=pl.BlockSpec((1, tq, C),
                                   lambda b, t, qid, kid: (b, qid[t], 0)),
            scratch_shapes=[
                pltpu.VMEM((n_head, tq), jnp.float32),      # running max  m (lane-dense 2-D)
                pltpu.VMEM((n_head, tq), jnp.float32),      # running sum  l (lane-dense 2-D)
                pltpu.VMEM((n_head, tq, D), jnp.float32),   # accumulator
            ],
        ),
        compiler_params=pltpu.CompilerParams(
            dimension_semantics=("parallel", "arbitrary"),
            vmem_limit_bytes=vmem_limit),
        cost_estimate=attn_cost,
    )(q_ids, k_ids, q, k, v, w_p, b_p)

    return out


# --------------------------------------------------------------------------- #
# Pure-JAX reference mirroring the PyTorch forward (eval mode)                #
# --------------------------------------------------------------------------- #
def _reference(x, params, n_head):
    B, T, C = x.shape
    D = C // n_head

    def lin(t, w, b):
        return t @ w + b  # w already (in, out)

    q = lin(x, params["wq"], params["bq"]).reshape(B, T, n_head, D).transpose(0, 2, 1, 3)
    k = lin(x, params["wk"], params["bk"]).reshape(B, T, n_head, D).transpose(0, 2, 1, 3)
    v = lin(x, params["wv"], params["bv"]).reshape(B, T, n_head, D).transpose(0, 2, 1, 3)
    att = jnp.einsum("bhtd,bhsd->bhts", q, k) / math.sqrt(D)
    mask = jnp.tril(jnp.ones((T, T), dtype=bool))
    att = jnp.where(mask, att, -jnp.inf)
    att = jax.nn.softmax(att, axis=-1)
    y = jnp.einsum("bhts,bhsd->bhtd", att, v)
    y = y.transpose(0, 2, 1, 3).reshape(B, T, C)
    return lin(y, params["wp"], params["bp"])


if __name__ == "__main__":
    # config: n_embd=32, n_head=4, max_len >= T; batch=2, seq=8
    B, T, C, H = 2, 8, 32, 4

    key = jax.random.PRNGKey(0)
    ks = jax.random.split(key, 9)
    s = 0.02
    params = {
        "wq": s * jax.random.normal(ks[0], (C, C), jnp.float32),
        "bq": s * jax.random.normal(ks[1], (1, C), jnp.float32),
        "wk": s * jax.random.normal(ks[2], (C, C), jnp.float32),
        "bk": s * jax.random.normal(ks[3], (1, C), jnp.float32),
        "wv": s * jax.random.normal(ks[4], (C, C), jnp.float32),
        "bv": s * jax.random.normal(ks[5], (1, C), jnp.float32),
        "wp": s * jax.random.normal(ks[6], (C, C), jnp.float32),
        "bp": s * jax.random.normal(ks[7], (1, C), jnp.float32),
    }
    x = jax.random.normal(ks[8], (B, T, C), jnp.float32)

    out = jax.block_until_ready(causal_self_attention(x, params, n_head=H))

    ref = _reference(x, params, H)
    assert out.shape == (B, T, C)
    # bf16 matmul operands (f32 accumulate) + approx reciprocal => tolerance looser than f32.
    assert jnp.allclose(out, ref, atol=2e-3, rtol=2e-2), \
        f"mismatch vs reference: max abs err {jnp.max(jnp.abs(out - ref))}"

    print("KERNEL_OK")
</pallas_src>

<mosaic_0001>
module attributes {stable_mosaic.version = 11 : i64} {
  func.func @_qkv_proj_kernel(%arg0: i32, %arg1: i32, %arg2: memref<1x8x32xf32, #tpu.memory_space<vmem>>, %arg3: memref<32x96xbf16, #tpu.memory_space<vmem>>, %arg4: memref<1x96xf32, #tpu.memory_space<vmem>>, %arg5: memref<1x4x8x8xbf16, #tpu.memory_space<vmem>>, %arg6: memref<1x4x8x8xbf16, #tpu.memory_space<vmem>>, %arg7: memref<1x4x8x8xbf16, #tpu.memory_space<vmem>>) attributes {dimension_semantics = [#tpu.dimension_semantics<parallel>, #tpu.dimension_semantics<parallel>], iteration_bounds = array<i64: 2, 1>, scalar_prefetch = 0 : i64, scratch_operands = 0 : i64, tpu.core_type = #tpu.core_type<tc>, window_params = [{transform_indices = @transform_0, window_bounds = array<i64: 1, 8, 32>}, {pipeline_mode = #tpu.pipeline_mode<synchronous>, transform_indices = @transform_1, window_bounds = array<i64: 32, 96>}, {pipeline_mode = #tpu.pipeline_mode<synchronous>, transform_indices = @transform_2, window_bounds = array<i64: 1, 96>}, {transform_indices = @transform_3, window_bounds = array<i64: 1, 4, 8, 8>}, {transform_indices = @transform_4, window_bounds = array<i64: 1, 4, 8, 8>}, {transform_indices = @transform_5, window_bounds = array<i64: 1, 4, 8, 8>}]} {
    %c0 = arith.constant 0 : index
    %c0_0 = arith.constant 0 : index
    %c0_1 = arith.constant 0 : index
    %0 = vector.load %arg2[%c0, %c0_0, %c0_1] : memref<1x8x32xf32, #tpu.memory_space<vmem>>, vector<1x8x32xf32>
    %1 = vector.shape_cast %0 : vector<1x8x32xf32> to vector<8x32xf32>
    %2 = arith.truncf %1 : vector<8x32xf32> to vector<8x32xbf16>
    %c0_2 = arith.constant 0 : index
    %c0_3 = arith.constant 0 : index
    %3 = vector.load %arg3[%c0_2, %c0_3] : memref<32x96xbf16, #tpu.memory_space<vmem>>, vector<32x96xbf16>
    %cst = arith.constant dense<0.000000e+00> : vector<8x96xf32>
    %4 = tpu.matmul %2, %3, %cst {dimension_numbers = #tpu.dot_dimension_numbers<[1], [0], [0], [1], [0, 0, 1, 1], [], []>} : vector<8x32xbf16>, vector<32x96xbf16>, vector<8x96xf32> -> vector<8x96xf32>
    %c0_4 = arith.constant 0 : index
    %c0_5 = arith.constant 0 : index
    %5 = vector.load %arg4[%c0_4, %c0_5] : memref<1x96xf32, #tpu.memory_space<vmem>>, vector<1x96xf32>
    %6 = vector.broadcast %5 : vector<1x96xf32> to vector<8x96xf32>
    %7 = arith.addf %4, %6 : vector<8x96xf32>
    %8 = vector.extract_strided_slice %7 {offsets = [0, 0], sizes = [8, 32], strides = [1, 1]} : vector<8x96xf32> to vector<8x32xf32>
    %9 = vector.shape_cast %8 : vector<8x32xf32> to vector<8x4x8xf32>
    %10 = tpu.transpose %9, [1, 0, 2] : vector<8x4x8xf32> -> vector<4x8x8xf32>
    %cst_6 = arith.constant 0.353553385 : f32
    %11 = vector.broadcast %cst_6 : f32 to vector<4x8x8xf32>
    %12 = arith.mulf %10, %11 : vector<4x8x8xf32>
    %13 = arith.truncf %12 : vector<4x8x8xf32> to vector<4x8x8xbf16>
    %c0_7 = arith.constant 0 : index
    %c0_8 = arith.constant 0 : index
    %c0_9 = arith.constant 0 : index
    %c0_10 = arith.constant 0 : index
    %14 = vector.load %arg5[%c0_7, %c0_8, %c0_9, %c0_10] : memref<1x4x8x8xbf16, #tpu.memory_space<vmem>>, vector<1x4x8x8xbf16>
    %15 = vector.shape_cast %14 : vector<1x4x8x8xbf16> to vector<4x8x8xbf16>
    %16 = vector.shape_cast %13 : vector<4x8x8xbf16> to vector<1x4x8x8xbf16>
    tpu.vector_store %arg5[%c0_7, %c0_8, %c0_9, %c0_10], %16 {strides = array<i32>} : memref<1x4x8x8xbf16, #tpu.memory_space<vmem>>, vector<1x4x8x8xbf16>,
    %17 = vector.extract_strided_slice %7 {offsets = [0, 32], sizes = [8, 32], strides = [1, 1]} : vector<8x96xf32> to vector<8x32xf32>
    %18 = vector.shape_cast %17 : vector<8x32xf32> to vector<8x4x8xf32>
    %19 = tpu.transpose %18, [1, 0, 2] : vector<8x4x8xf32> -> vector<4x8x8xf32>
    %20 = arith.truncf %19 : vector<4x8x8xf32> to vector<4x8x8xbf16>
    %c0_11 = arith.constant 0 : index
    %c0_12 = arith.constant 0 : index
    %c0_13 = arith.constant 0 : index
    %c0_14 = arith.constant 0 : index
    %21 = vector.load %arg6[%c0_11, %c0_12, %c0_13, %c0_14] : memref<1x4x8x8xbf16, #tpu.memory_space<vmem>>, vector<1x4x8x8xbf16>
    %22 = vector.shape_cast %21 : vector<1x4x8x8xbf16> to vector<4x8x8xbf16>
    %23 = vector.shape_cast %20 : vector<4x8x8xbf16> to vector<1x4x8x8xbf16>
    tpu.vector_store %arg6[%c0_11, %c0_12, %c0_13, %c0_14], %23 {strides = array<i32>} : memref<1x4x8x8xbf16, #tpu.memory_space<vmem>>, vector<1x4x8x8xbf16>,
    %24 = vector.extract_strided_slice %7 {offsets = [0, 64], sizes = [8, 32], strides = [1, 1]} : vector<8x96xf32> to vector<8x32xf32>
    %25 = vector.shape_cast %24 : vector<8x32xf32> to vector<8x4x8xf32>
    %26 = tpu.transpose %25, [1, 0, 2] : vector<8x4x8xf32> -> vector<4x8x8xf32>
    %27 = arith.truncf %26 : vector<4x8x8xf32> to vector<4x8x8xbf16>
    %c0_15 = arith.constant 0 : index
    %c0_16 = arith.constant 0 : index
    %c0_17 = arith.constant 0 : index
    %c0_18 = arith.constant 0 : index
    %28 = vector.load %arg7[%c0_15, %c0_16, %c0_17, %c0_18] : memref<1x4x8x8xbf16, #tpu.memory_space<vmem>>, vector<1x4x8x8xbf16>
    %29 = vector.shape_cast %28 : vector<1x4x8x8xbf16> to vector<4x8x8xbf16>
    %30 = vector.shape_cast %27 : vector<4x8x8xbf16> to vector<1x4x8x8xbf16>
    tpu.vector_store %arg7[%c0_15, %c0_16, %c0_17, %c0_18], %30 {strides = array<i32>} : memref<1x4x8x8xbf16, #tpu.memory_space<vmem>>, vector<1x4x8x8xbf16>,
    return
  }
  func.func @transform_0(%arg0: i32, %arg1: i32) -> (i32, i32, i32) {
    %c0_i32 = arith.constant 0 : i32
    %c0_i32_0 = arith.constant 0 : i32
    return %arg0, %arg1, %c0_i32 : i32, i32, i32
  }
  func.func @transform_1(%arg0: i32, %arg1: i32) -> (i32, i32) {
    %c0_i32 = arith.constant 0 : i32
    %c0_i32_0 = arith.constant 0 : i32
    %c0_i32_1 = arith.constant 0 : i32
    return %c0_i32, %c0_i32_0 : i32, i32
  }
  func.func @transform_2(%arg0: i32, %arg1: i32) -> (i32, i32) {
    %c0_i32 = arith.constant 0 : i32
    %c0_i32_0 = arith.constant 0 : i32
    %c0_i32_1 = arith.constant 0 : i32
    return %c0_i32, %c0_i32_0 : i32, i32
  }
  func.func @transform_3(%arg0: i32, %arg1: i32) -> (i32, i32, i32, i32) {
    %c0_i32 = arith.constant 0 : i32
    %c0_i32_0 = arith.constant 0 : i32
    %c0_i32_1 = arith.constant 0 : i32
    return %arg0, %c0_i32, %arg1, %c0_i32_0 : i32, i32, i32, i32
  }
  func.func @transform_4(%arg0: i32, %arg1: i32) -> (i32, i32, i32, i32) {
    %c0_i32 = arith.constant 0 : i32
    %c0_i32_0 = arith.constant 0 : i32
    %c0_i32_1 = arith.constant 0 : i32
    return %arg0, %c0_i32, %arg1, %c0_i32_0 : i32, i32, i32, i32
  }
  func.func @transform_5(%arg0: i32, %arg1: i32) -> (i32, i32, i32, i32) {
    %c0_i32 = arith.constant 0 : i32
    %c0_i32_0 = arith.constant 0 : i32
    %c0_i32_1 = arith.constant 0 : i32
    return %arg0, %c0_i32, %arg1, %c0_i32_0 : i32, i32, i32, i32
  }
}

</mosaic_0001>

<bundles_post_ra>
// kernel: tpu_custom_call.1
= control target key start
LH: loop header
LB: loop body
LE: loop exit
PB: predicated region body
PF: predicated region fallthrough
CT: control target
= control target key end

     0   :  { %s1704_s0 = inlined_call_operand.hbm [shape: f32[2,8,32], index: 0, kind: input, shape index: {}]   ;;  %s1705_s1 = inlined_call_operand.hbm [shape: bf16[32,96], index: 1, kind: input, shape index: {}]   ;;  %s1706_s2 = inlined_call_operand.vmem [shape: f32[1,96], index: 2, kind: input, shape index: {}]   ;;  %s1707_s3 = inlined_call_operand.hbm [shape: bf16[2,4,8,8], index: 3, kind: output, shape index: {0}]   ;;  %s1708_s4 = inlined_call_operand.hbm [shape: bf16[2,4,8,8], index: 4, kind: output, shape index: {1}]   ;;  %s1709_s5 = inlined_call_operand.hbm [shape: bf16[2,4,8,8], index: 5, kind: output, shape index: {2}]  }
   0x1   :  { %1713 = sst [smem:[#allocation15_spill]] %s1704_s0 }
   0x2   :  { %1714 = sst [smem:[#allocation16_spill]] %s1705_s1 }
   0x3   :  { %11 = vsyncpa [#allocation3], 0 }
   0x4   :  { %13 = vsyncpa [#allocation3 + $0x1], 0 }
   0x5   :  { %14 = vsyncpa [#allocation6], 0 }
   0x6   :  { %15 = vsyncpa [#allocation4], 0 }
   0x7   :  { %17 = vsyncpa [#allocation4 + $0x1], 0 }
   0x8   :  { %18 = vsyncpa [#allocation9], 0 }
   0x9   :  { %20 = vsyncpa [#allocation9 + $0x1], 0  ;;  %s1357_s18 = smov 0   ;;  %s1359_s19 = smov 0  }
   0xa   :  { %s1361_s20 = smov 0   ;;  %s1363_s21 = smov 0  }
   0xb   :  { %s1365_s22 = smov 0   ;;  %s1367_s23 = smov 0  }
   0xc LB: > { %s1388_s24 = sadd.s32 4294967295, %s1314_s23   ;;  %p958_p0 = scmp.ge.s32.totalorder %s1314_s23, 1  ;;  %s1314_s23 = sphi %s1367_s23, %s26_s23   ;;  %s1310_s22 = sphi %s1365_s22, %s1728_s22   ;;  %s1306_s21 = sphi %s1363_s21, %s1727_s21   ;;  %s1302_s20 = sphi %s1361_s20, %s1726_s20   ;;  %s1298_s19 = sphi %s1359_s19, %s1725_s19   ;;  %s1294_s18 = sphi %s1357_s18, %s1724_s18  }
   0xd   : > { %p61_p1 = scmp.eq.s32.totalorder %s1388_s24, 0  ;;  %p197_p2 = scmp.lt.s32.totalorder %s1314_s23, 3 }
   0xe   : > { %s1715_s1 = sld [smem:[#allocation16_spill]]  ;;  %s1316_s29 = smov [#allocation5]  }
   0xf   : > { %p1396_p3 = pnand %p958_p0, %p197_p2  ;;  %s210_s30 = sshll.u32 %s1316_s29, 4  ;;  %s211_s30 = int_to_ptr.vmem [resolvable:$true] %s210_s30 }
  0x10   : > { %p960_p6 = scmp.ge.s32.totalorder %s1314_s23, 2  ;;  %s1317_s6 = smov 64  }
  0x11   : > { %p1006_p4 = pneg %p1396_p3  ;;  %s1318_s7 = smov 4  }
  0x12   : > { %s1710_s8 = sadd.s32 4294967294, %s1314_s23   ;;  %s38_s9 = sadd.s32 1, %s1310_s22 }
  0x13   : > { %p1007_p5 = pnand %p1006_p4, %p61_p1  ;;  %s47_s10 = sadd.s32 1, %s1302_s20 }
  0x14   : > { %s208_s27 = sshll.u32 %s1715_s1, 4  ;;  %p40_p7 = scmp.ge.s32.totalorder %s38_s9, 2  ;;  %s209_s27 = int_to_ptr.hbm [resolvable:$true] %s208_s27 }
  0x15   : > { %1009 = dma.hbm_to_vmem [thread:$0]  (!%p1007_p5), %s209_s27, 256, %s211_s30, [#allocation6], %s1317_s6, %s1317_s6, %s1318_s7  }
  0x16   : > { %p54_p8 = scmp.ne.s32.totalorder %s1302_s20, %s1298_s19  ;;  %p55_p9 = scmp.eq.s32.totalorder %s1314_s23, 0 }
  0x17   : > { %p60_p10 = scmp.ne.s32.totalorder %s1298_s19, %s1294_s18  ;;  %s1730_s9 = smov (%p40_p7, %s38_s9), 0 }
  0x18   : > { %p1415_p11 = por %p55_p9, %p54_p8  ;;  %s42_s13 = ssub.s32 %s1310_s22, %s1730_s9 }
  0x19   : > { %p1421_p12 = por %p61_p1, %p60_p10  ;;  %p128_p13 = scmp.eq.s32.totalorder %s1388_s24, 1 }
  0x1a   : > { %p45_p0 = scmp.eq.s32.totalorder %s42_s13, 0  ;;  %p134_p2 = scmp.eq.s32.totalorder %s1710_s8, 1 }
  0x1b   : > { %p1430_p4 = por %p128_p13, %p54_p8  ;;  %p1025_p5 = scmp.lt.s32.totalorder %s1314_s23, 2 }
  0x1c   : > { %s1436_s15 = scalar_select %p45_p0, %s1302_s20, %s47_s10  }
  0x1d   : > { %p1438_p7 = por %p134_p2, %p60_p10  ;;  %s227_s17 = sand.u32 1, %s1302_s20  }
  0x1e   : > { %s961_s25 = sshll.u32 %s227_s17, 3  ;;  %s962_s26 = sshll.u32 %s1310_s22, 3 }
  0x1f   : > { %s1721_s0 = sld [smem:[#allocation15_spill]]  ;;  %s231_s6 = scalar_lea.vmem [#allocation2], %s961_s25 }
  0x20   : > { %s240_s7 = sshll.u32 %s231_s6, 4  ;;  %p1011_p8 = pnand %p1025_p5, %p1415_p11  ;;  %s241_s7 = int_to_ptr.vmem [resolvable:$true] %s240_s7 }
  0x21   : > { %s228_s10 = scalar_lea.sflag [#allocation3], %s227_s17  ;;  %s1452_s8 = sand.u32 (!%p1396_p3), 1, %s1298_s19  }
  0x22   : > { %s964_s27 = sshll.u32 (!%p1396_p3), %s1452_s8, 3 }
  0x23   : > { %249 = sbr.rel (%p1396_p3) target bundleno = 459 (0x1cb), region = 32  ;;  %s255_s25 = scalar_lea.vmem (!%p1396_p3), [#allocation2], %s964_s27 }
  0x25   : > { %s236_s30 = scalar_lea.hbm %s1721_s0, %s962_s26  ;;  %s252_s26 = scalar_lea.sflag (!%p1396_p3), [#allocation3], %s1452_s8 }
  0x26   : > { %s238_s13 = sshll.u32 %s236_s30, 4  ;;  %s239_s13 = int_to_ptr.hbm [resolvable:$true] %s238_s13 }
  0x27   : > { %1013 = dma.hbm_to_vmem [thread:$0]  (!%p1011_p8), %s239_s13, 128, %s241_s7, %s228_s10  }
  0x28   : > { %1277 = dma.done.wait (%p1421_p12), %s252_s26, 128  }
  0x29   : > { %1279 = vsyncadd (%p1421_p12), %s252_s26, 4294967168 }
  0x2a   : > { %1281 = dma.done.wait (%p61_p1), [#allocation6], 256  }
  0x2b   : > { %1283 = vsyncadd (%p61_p1), [#allocation6], 4294967040  ;;  %v990_v0 = vld [vmem:[#allocation5 + $0x8] sm:$0xff]  ;;  %v989_v1 = vld [vmem:[#allocation5] sm:$0xff]  ;;  %vm321_vm0 = vcmask 261120   ;;  %s1319_s12 = smov 104  }
  0x2c   : > { %331 = vmatpush.bf16.msra.mxu0 %v990_v0  ;;  %v299_v2 = vld [vmem:[%s255_s25] sm:$0xff]  ;;  %s1320_s17 = smov 112   ;;  %s1321_s29 = smov 120   ;;  %v1322_v8 = vmov 1983009808   ;;  %vm349_vm1 = vcmask 1047556  }
  0x2d   : > { %v300_v3 = vpack.c.bf16 %v299_v2, %v299_v2  ;;  %v1107_v4 = vld [vmem:[%s1706_s2] ss:$0 sm:$0xff]  ;;  %v354_v9 = vunpack.c.l.s4 %v1322_v8  ;;  %s1711_s30 = smov 64   ;;  %s1324_s6 = smov 96   ;;  %v1325_v17 = vmov 1934713408  }
  0x2e   : > { %v378_v18 = vunpack.c.l.s4 %v1325_v17  ;;  %s1509_s7 = sshll.u32 %s1452_s8, 4  ;;  %vm467_vm2 = vcmask 60416   ;;  %s1520_s10 = sshll.u32 %s1306_s21, 4 }
  0x2f   : > { %v1469_v16 = vunpack.c.0.s8 %v354_v9  ;;  %s283_s13 = scalar_lea.vmem [#allocation7], %s1509_s7  ;;  %s755_s25 = scalar_lea.hbm %s1707_s3, %s1520_s10 }
  0x30   : > { %332 = vmatpush.bf16.msra.mxu0 %v989_v1  ;;  %v1474_v23 = vunpack.c.0.s8 %v378_v18  ;;  %s756_s28 = sshll.u32 %s283_s13, 4  ;;  %s758_s11 = sshll.u32 %s755_s25, 4  ;;  %s757_s28 = int_to_ptr.vmem [resolvable:$true] %s756_s28  ;;  %s759_s11 = int_to_ptr.hbm [resolvable:$true] %s758_s11 }
  0x33   : > { %977 = vmatmul.msk.bf16.vlgmr.msra.gmra.mxu0 %vm321_vm0, %v300_v3 }
  0xb0   : > { %v334_v5 = vpop.f32.mrf.mxu0 }
  0xb1   : > { %v335_v6 = vadd.f32 %v1107_v4, %v334_v5 }
  0xb3   : > { %345 = vrot.lane.b32.xlu1 %v335_v6, %s1319_s12  ;;  %342 = vrot.lane.b32.xlu0 %v335_v6, %s1320_s17  ;;  %v351_v14 = vrot.slane %v335_v6, 4  ;;  %s733_s12 = scalar_lea.sflag [#allocation4], %s1452_s8  ;;  %s1182_s17 = sshra.s32 %s759_s11, 4  ;;  %s1183_s17 = int_to_ptr.hbm [resolvable:$true] %s1182_s17 }
  0xb4   : > { %p1189_p10 = scmp.lt.s32.totalorder %s1183_s17, %s1707_s3 }
  0xb8   : > { %v336_v7 = vpop.f32.mrf.mxu0 }
  0xbb   : > { %339 = vrot.lane.b32.xlu0 %v335_v6, %s1321_s29  ;;  %s1184_s29 = scalar_lea.hbm %s1183_s17, 16 }
  0xbc   : > { %p1185_p1 = scmp.ne.s32.totalorder %s1183_s17, %s1184_s29 }
  0xbe   : > { %p1186_p3 = pnand %p1185_p1, %p1430_p4 }
  0xc0   : > { %p1187_p9 = pneg %p1186_p3 }
 0x125   : > { %v343_v10 = vpop.permute.xlu0 %342  ;;  %v346_v15 = vpop.permute.xlu1 %345 }
 0x126   : > { %v348_v11 = vrot.slane %v343_v10, 4  ;;  %v1092_v12 = vpack.i.bf16 %v343_v10, %v335_v6  ;;  %v352_v19 = vsel %vm349_vm1, %v343_v10, %v351_v14  ;;  %v361_v21 = vrot.slane %v346_v15, 4 }
 0x127   : > { %v360_v22 = vperm.slane %v352_v19, %v1469_v16 }
 0x128   : > { %v350_v13 = vsel %vm349_vm1, %v348_v11, %v335_v6  ;;  %1093 = vrot.lane.b32.xlu2 %v1092_v12, %s1711_s30  ;;  %1088 = vrot.lane.b32.xlu1 %v1092_v12, %s1324_s6 }
 0x129   : > { %v356_v20 = vperm.slane %v350_v13, %v1469_v16  ;;  %v387_v31 = vrot.slane %v360_v22, 4 }
 0x12b   : > { %v375_v28 = vrot.slane %v356_v20, 4 }
 0x12d   : > { %v340_v24 = vpop.permute.xlu0 %339 }
 0x12e   : > { %v362_v25 = vsel %vm349_vm1, %v361_v21, %v340_v24  ;;  %v363_v26 = vrot.slane %v340_v24, 4  ;;  %v1102_v27 = vpack.i.bf16 %v346_v15, %v340_v24 }
 0x12f   : > { %v368_v29 = vperm.slane %v362_v25, %v1469_v16 }
 0x130   : > { %v364_v30 = vsel %vm349_vm1, %v346_v15, %v363_v26  ;;  %1103 = vrot.lane.b32.xlu0 %v1102_v27, %s1711_s30  ;;  %1098 = vrot.lane.b32.xlu2 %v1102_v27, %s1324_s6  ;;  %s1188_s30 = scalar_lea.hbm %s1707_s3, 32 }
 0x131   : > { %v372_v32 = vperm.slane %v364_v30, %v1469_v16  ;;  %v373_v33 = vrot.slane %v368_v29, 4  ;;  %v376_v34 = vsel %vm349_vm1, %v368_v29, %v375_v28  ;;  %p1190_p11 = scmp.lt.s32.totalorder %s1188_s30, %s1184_s29 }
 0x132   : > { %v384_v35 = vperm.slane %v376_v34, %v1474_v23 }
 0x133   : > { %v374_v36 = vsel %vm349_vm1, %v373_v33, %v356_v20  ;;  %v385_v37 = vrot.slane %v372_v32, 4  ;;  %v388_v38 = vsel %vm349_vm1, %v372_v32, %v387_v31  ;;  %p1191_p12 = por %p1190_p11, %p1189_p10 }
 0x134   : > { %v380_v39 = vperm.slane %v374_v36, %v1474_v23  ;;  %v396_v40 = vperm.slane %v388_v38, %v1474_v23  ;;  %v399_v41 = vrot.slane %v384_v35, 4 }
 0x135   : > { %v386_v42 = vsel %vm349_vm1, %v385_v37, %v360_v22  ;;  %p1192_p13 = pnand %p1191_p12, %p1187_p9 }
 0x136   : > { %v392_v43 = vperm.slane %v386_v42, %v1474_v23  ;;  %v397_v44 = vrot.slane %v380_v39, 4  ;;  %v400_v45 = vsel %vm349_vm1, 0.0, %v399_v41  ;;  %v403_v46 = vrot.slane %v396_v40, 4 }
 0x137   : > { %v405_v47 = vsel %vm349_vm1, %v399_v41, %v380_v39  ;;  %v410_v48 = vrot.slane %v400_v45, 4 }
 0x138   : > { %v398_v49 = vsel %vm349_vm1, 0.0, %v397_v44  ;;  %v401_v50 = vrot.slane %v392_v43, 4  ;;  %v404_v51 = vsel %vm349_vm1, 0.0, %v403_v46  ;;  %v409_v52 = vperm.slane %v405_v47, %v1469_v16 }
 0x139   : > { %v411_v53 = vsel %vm349_vm1, %v410_v48, %v398_v49  ;;  %v416_v54 = vsel %vm349_vm1, %v403_v46, %v392_v43  ;;  %v421_v55 = vrot.slane %v404_v51, 4 }
 0x13a   : > { %v402_v56 = vsel %vm349_vm1, 0.0, %v401_v50  ;;  %v415_v57 = vperm.slane %v411_v53, %v1469_v16  ;;  %v420_v58 = vperm.slane %v416_v54, %v1469_v16  ;;  %v429_v59 = vrot.slane %v409_v52, 4 }
 0x13b   : > { %v422_v60 = vsel %vm349_vm1, %v421_v55, %v402_v56 }
 0x13c   : > { %v426_v61 = vperm.slane %v422_v60, %v1469_v16  ;;  %v427_v62 = vrot.slane %v415_v57, 4  ;;  %v430_v63 = vsel %vm349_vm1, %v415_v57, %v429_v59  ;;  %v441_v0 = vrot.slane %v420_v58, 4 }
 0x13d   : > { %v438_v1 = vperm.slane %v430_v63, %v1474_v23 }
 0x13e   : > { %v428_v2 = vsel %vm349_vm1, %v427_v62, %v409_v52  ;;  %v439_v3 = vrot.slane %v426_v61, 4  ;;  %v442_v4 = vsel %vm349_vm1, %v426_v61, %v441_v0 }
 0x13f   : > { %v434_v5 = vperm.slane %v428_v2, %v1474_v23  ;;  %v450_v6 = vperm.slane %v442_v4, %v1474_v23  ;;  %v457_v7 = vrot.slane %v438_v1, 4 }
 0x140   : > { %v440_v8 = vsel %vm349_vm1, %v439_v3, %v420_v58 }
 0x141   : > { %v446_v9 = vperm.slane %v440_v8, %v1474_v23  ;;  %v453_v10 = vrot.slane %v434_v5, 4  ;;  %v455_v11 = vrot.slane %v450_v6, 4  ;;  %v458_v12 = vsel %vm349_vm1, %v450_v6, %v457_v7 }
 0x142   : > { %v462_v13 = vmul.f32 0.35355338, %v458_v12 }
 0x143   : > { %v451_v14 = vrot.slane %v446_v9, 4  ;;  %v454_v15 = vsel %vm349_vm1, %v446_v9, %v453_v10  ;;  %v456_v17 = vsel %vm349_vm1, %v455_v11, %v438_v1 }
 0x144   : > { %v460_v18 = vmul.f32 0.35355338, %v454_v15  ;;  %v461_v19 = vmul.f32 0.35355338, %v456_v17  ;;  %v466_v20 = vpack.c.bf16 %v462_v13, %v462_v13 }
 0x145   : > { %v452_v21 = vsel %vm349_vm1, %v451_v14, %v434_v5 }
 0x146   : > { %v459_v22 = vmul.f32 0.35355338, %v452_v21  ;;  %v464_v24 = vpack.c.bf16 %v460_v18, %v460_v18  ;;  %v465_v25 = vpack.c.bf16 %v461_v19, %v461_v19  ;;  %471 = vst.msk [vmem:[%s283_s13 + $0xc] sm:$0xf] %vm467_vm2, %v466_v20 }
 0x148   : > { %v463_v26 = vpack.c.bf16 %v459_v22, %v459_v22  ;;  %469 = vst.msk [vmem:[%s283_s13 + $0x4] sm:$0xf] %vm467_vm2, %v464_v24 }
 0x149   : > { %470 = vst.msk [vmem:[%s283_s13 + $0x8] sm:$0xf] %vm467_vm2, %v465_v25 }
 0x14a   : > { %468 = vst.msk [vmem:[%s283_s13] sm:$0xf] %vm467_vm2, %v463_v26 }
 0x14b   : > { %1195 = shalt.err (!%p1192_p13)
}
 0x14c   : > { %s1326_s8 = smov 4   ;;  %s1722_s13 = smov 64  }
 0x14d   : > { %1000 = dma.vmem_to_hbm [thread:$0]  (%p1430_p4), %s757_s28, 256, %s759_s11, %s733_s12, %s1722_s13, %s1722_s13, %s1326_s8  }
 0x14e   : > { %s773_s30 = scalar_lea.hbm %s1708_s4, %s1520_s10  ;;  %s737_s27 = sand.u32 1, %s1388_s24  }
 0x14f   : > { %s290_s26 = scalar_lea.vmem [#allocation8], %s1509_s7  ;;  %s1603_s28 = sshll.u32 %s773_s30, 4  ;;  %s777_s28 = int_to_ptr.hbm [resolvable:$true] %s1603_s28 }
 0x150   : > { %s774_s25 = sshll.u32 %s290_s26, 4  ;;  %s1624_s11 = scalar_lea.sflag [#allocation9], %s737_s27  ;;  %s775_s25 = int_to_ptr.vmem [resolvable:$true] %s774_s25 }
 0x151   : > { %s1210_s12 = sshra.s32 %s777_s28, 4  ;;  %s1216_s6 = scalar_lea.hbm %s1708_s4, 32  ;;  %s1211_s12 = int_to_ptr.hbm [resolvable:$true] %s1210_s12 }
 0x152   : > { %s1212_s17 = scalar_lea.hbm %s1211_s12, 16  ;;  %p1217_p8 = scmp.lt.s32.totalorder %s1211_s12, %s1708_s4 }
 0x153   : > { %p1213_p0 = scmp.ne.s32.totalorder %s1211_s12, %s1212_s17  ;;  %p1218_p1 = scmp.lt.s32.totalorder %s1216_s6, %s1212_s17 }
 0x155   : > { %p1214_p2 = pnand %p1213_p0, %p1430_p4  ;;  %p1219_p3 = por %p1218_p1, %p1217_p8 }
 0x157   : > { %p1215_p5 = pneg %p1214_p2 }
 0x159   : > { %p1220_p9 = pnand %p1219_p3, %p1215_p5 }
 0x182   : > { %v1094_v27 = vpop.permute.xlu2 %1093 }
 0x183   : > { %v1096_v33 = vunpack.i.h.bf16 %v1094_v27  ;;  %v1095_v34 = vunpack.i.l.bf16 %v1094_v27 }
 0x185   : > { %v614_v42 = vrot.slane %v1096_v33, 4  ;;  %v616_v43 = vrot.slane %v1095_v34, 4 }
 0x187   : > { %v615_v52 = vsel %vm349_vm1, %v614_v42, %v1095_v34  ;;  %v617_v53 = vsel %vm349_vm1, %v1096_v33, %v616_v43 }
 0x188   : > { %v621_v63 = vperm.slane %v615_v52, %v1469_v16  ;;  %v625_v0 = vperm.slane %v617_v53, %v1469_v16 }
 0x18a   : > { %v1099_v28 = vpop.permute.xlu2 %1098  ;;  %v640_v11 = vrot.slane %v621_v63, 4  ;;  %v652_v12 = vrot.slane %v625_v0, 4 }
 0x18b   : > { %v1101_v29 = vunpack.i.h.bf16 %v1099_v28  ;;  %v1100_v30 = vunpack.i.l.bf16 %v1099_v28 }
 0x18d   : > { %v496_v31 = vrot.slane %v1101_v29, 4  ;;  %v498_v32 = vrot.slane %v1100_v30, 4 }
 0x18f   : > { %v497_v35 = vsel %vm349_vm1, %v496_v31, %v1100_v30  ;;  %v499_v36 = vsel %vm349_vm1, %v1101_v29, %v498_v32 }
 0x190   : > { %v503_v40 = vperm.slane %v497_v35, %v1469_v16  ;;  %v507_v41 = vperm.slane %v499_v36, %v1469_v16 }
 0x192   : > { %v508_v48 = vrot.slane %v503_v40, 4  ;;  %v520_v49 = vrot.slane %v507_v41, 4 }
 0x19a   : > { %v1089_v37 = vpop.permute.xlu1 %1088 }
 0x19b   : > { %v1091_v38 = vunpack.i.h.bf16 %v1089_v37  ;;  %v1090_v39 = vunpack.i.l.bf16 %v1089_v37 }
 0x19d   : > { %v484_v44 = vrot.slane %v1091_v38, 4  ;;  %v486_v45 = vrot.slane %v1090_v39, 4 }
 0x19f   : > { %v485_v46 = vsel %vm349_vm1, %v484_v44, %v1090_v39  ;;  %v487_v47 = vsel %vm349_vm1, %v1091_v38, %v486_v45 }
 0x1a0   : > { %v491_v50 = vperm.slane %v485_v46, %v1469_v16  ;;  %v495_v51 = vperm.slane %v487_v47, %v1469_v16 }
 0x1a2   : > { %v1104_v54 = vpop.permute.xlu0 %1103  ;;  %v509_v55 = vsel %vm349_vm1, %v508_v48, %v491_v50  ;;  %v510_v56 = vrot.slane %v491_v50, 4  ;;  %v521_v57 = vsel %vm349_vm1, %v520_v49, %v495_v51  ;;  %v522_v58 = vrot.slane %v495_v51, 4 }
 0x1a3   : > { %v515_v59 = vperm.slane %v509_v55, %v1474_v23  ;;  %v527_v60 = vperm.slane %v521_v57, %v1474_v23  ;;  %v1106_v61 = vunpack.i.h.bf16 %v1104_v54  ;;  %v1105_v62 = vunpack.i.l.bf16 %v1104_v54 }
 0x1a4   : > { %v511_v1 = vsel %vm349_vm1, %v503_v40, %v510_v56  ;;  %v523_v2 = vsel %vm349_vm1, %v507_v41, %v522_v58 }
 0x1a5   : > { %v519_v3 = vperm.slane %v511_v1, %v1474_v23  ;;  %v531_v4 = vperm.slane %v523_v2, %v1474_v23  ;;  %v626_v5 = vrot.slane %v1106_v61, 4  ;;  %v628_v6 = vrot.slane %v1105_v62, 4 }
 0x1a6   : > { %v532_v7 = vrot.slane %v515_v59, 4  ;;  %v536_v9 = vrot.slane %v527_v60, 4 }
 0x1a7   : > { %v534_v8 = vrot.slane %v519_v3, 4  ;;  %v538_v10 = vrot.slane %v531_v4, 4  ;;  %v627_v13 = vsel %vm349_vm1, %v626_v5, %v1105_v62  ;;  %v629_v14 = vsel %vm349_vm1, %v1106_v61, %v628_v6 }
 0x1a8   : > { %v533_v25 = vsel %vm349_vm1, 0.0, %v532_v7  ;;  %v537_v26 = vsel %vm349_vm1, 0.0, %v536_v9  ;;  %v633_v27 = vperm.slane %v627_v13, %v1469_v16  ;;  %v637_v28 = vperm.slane %v629_v14, %v1469_v16 }
 0x1a9   : > { %v535_v15 = vsel %vm349_vm1, 0.0, %v534_v8  ;;  %v539_v17 = vsel %vm349_vm1, 0.0, %v538_v10  ;;  %v540_v18 = vsel %vm349_vm1, %v534_v8, %v515_v59  ;;  %v551_v19 = vsel %vm349_vm1, %v538_v10, %v527_v60 }
 0x1aa   : > { %v544_v20 = vperm.slane %v540_v18, %v1469_v16  ;;  %v545_v21 = vrot.slane %v535_v15, 4  ;;  %v555_v22 = vperm.slane %v551_v19, %v1469_v16  ;;  %v556_v24 = vrot.slane %v539_v17, 4 }
 0x1ab   : > { %v638_v35 = vrot.slane %v633_v27, 4  ;;  %v641_v36 = vsel %vm349_vm1, %v633_v27, %v640_v11  ;;  %v650_v38 = vrot.slane %v637_v28, 4  ;;  %v653_v39 = vsel %vm349_vm1, %v637_v28, %v652_v12 }
 0x1ac   : > { %v546_v29 = vsel %vm349_vm1, %v545_v21, %v533_v25  ;;  %v557_v30 = vsel %vm349_vm1, %v556_v24, %v537_v26  ;;  %v564_v31 = vrot.slane %v544_v20, 4  ;;  %v576_v32 = vrot.slane %v555_v22, 4 }
 0x1ad   : > { %v550_v33 = vperm.slane %v546_v29, %v1469_v16  ;;  %v561_v34 = vperm.slane %v557_v30, %v1469_v16  ;;  %v649_v37 = vperm.slane %v641_v36, %v1474_v23  ;;  %v639_v46 = vsel %vm349_vm1, %v638_v35, %v621_v63 }
 0x1ae   : > { %v651_v47 = vsel %vm349_vm1, %v650_v38, %v625_v0  ;;  %v645_v50 = vperm.slane %v639_v46, %v1474_v23  ;;  %v661_v56 = vperm.slane %v653_v39, %v1474_v23 }
 0x1af   : > { %v562_v40 = vrot.slane %v550_v33, 4  ;;  %v565_v41 = vsel %vm349_vm1, %v550_v33, %v564_v31  ;;  %v574_v42 = vrot.slane %v561_v34, 4  ;;  %v577_v43 = vsel %vm349_vm1, %v561_v34, %v576_v32 }
 0x1b0   : > { %v573_v44 = vperm.slane %v565_v41, %v1474_v23  ;;  %v585_v45 = vperm.slane %v577_v43, %v1474_v23  ;;  %v657_v51 = vperm.slane %v651_v47, %v1474_v23  ;;  %v662_v57 = vrot.slane %v645_v50, 4 }
 0x1b1   : > { %v563_v48 = vsel %vm349_vm1, %v562_v40, %v544_v20  ;;  %v575_v49 = vsel %vm349_vm1, %v574_v42, %v555_v22  ;;  %v664_v58 = vrot.slane %v649_v37, 4  ;;  %v668_v6 = vrot.slane %v661_v56, 4 }
 0x1b2   : > { %v569_v52 = vperm.slane %v563_v48, %v1474_v23  ;;  %v581_v53 = vperm.slane %v575_v49, %v1474_v23  ;;  %v590_v54 = vrot.slane %v585_v45, 4  ;;  %v592_v55 = vrot.slane %v573_v44, 4 }
 0x1b3   : > { %v666_v59 = vrot.slane %v657_v51, 4  ;;  %v665_v2 = vsel %vm349_vm1, 0.0, %v664_v58  ;;  %v663_v5 = vsel %vm349_vm1, 0.0, %v662_v57  ;;  %v670_v9 = vsel %vm349_vm1, %v664_v58, %v645_v50 }
 0x1b4   : > { %v586_v60 = vrot.slane %v581_v53, 4  ;;  %v588_v61 = vrot.slane %v569_v52, 4  ;;  %v591_v62 = vsel %vm349_vm1, %v590_v54, %v573_v44  ;;  %v593_v63 = vsel %vm349_vm1, %v585_v45, %v592_v55 }
 0x1b5   : > { %v596_v0 = vpack.c.bf16 %v591_v62, %v591_v62  ;;  %v597_v1 = vpack.c.bf16 %v593_v63, %v593_v63  ;;  %v675_v10 = vrot.slane %v665_v2, 4  ;;  %v667_v11 = vsel %vm349_vm1, 0.0, %v666_v59 }
 0x1b6   : > { %v587_v3 = vsel %vm349_vm1, %v586_v60, %v569_v52  ;;  %v589_v4 = vsel %vm349_vm1, %v581_v53, %v588_v61  ;;  %v669_v12 = vsel %vm349_vm1, 0.0, %v668_v6  ;;  %v674_v13 = vperm.slane %v670_v9, %v1469_v16 }
 0x1b7   : > { %v594_v7 = vpack.c.bf16 %v587_v3, %v587_v3  ;;  %v595_v8 = vpack.c.bf16 %v589_v4, %v589_v4  ;;  %600 = vst.msk [vmem:[%s290_s26 + $0x8] sm:$0xf] %vm467_vm2, %v596_v0  ;;  %v681_v14 = vsel %vm349_vm1, %v668_v6, %v657_v51  ;;  %v676_v15 = vsel %vm349_vm1, %v675_v10, %v663_v5 }
 0x1b8   : > { %601 = vst.msk [vmem:[%s290_s26 + $0xc] sm:$0xf] %vm467_vm2, %v597_v1  ;;  %v685_v17 = vperm.slane %v681_v14, %v1469_v16  ;;  %v686_v18 = vrot.slane %v669_v12, 4  ;;  %v680_v19 = vperm.slane %v676_v15, %v1469_v16  ;;  %v694_v20 = vrot.slane %v674_v13, 4 }
 0x1b9   : > { %598 = vst.msk [vmem:[%s290_s26] sm:$0xf] %vm467_vm2, %v594_v7 }
 0x1ba   : > { %599 = vst.msk [vmem:[%s290_s26 + $0x4] sm:$0xf] %vm467_vm2, %v595_v8  ;;  %v687_v21 = vsel %vm349_vm1, %v686_v18, %v667_v11  ;;  %v706_v22 = vrot.slane %v685_v17, 4 }
 0x1bb   : > { %1223 = shalt.err (!%p1220_p9)
}
 0x1bc   : > { %1001 = dma.vmem_to_hbm [thread:$0]  (%p1430_p4), %s775_s25, 256, %s777_s28, %s1624_s11, %s1722_s13, %s1722_s13, %s1326_s8   ;;  %v691_v24 = vperm.slane %v687_v21, %v1469_v16  ;;  %v692_v25 = vrot.slane %v680_v19, 4  ;;  %v695_v26 = vsel %vm349_vm1, %v680_v19, %v694_v20 }
 0x1bd   : > { %v703_v27 = vperm.slane %v695_v26, %v1474_v23  ;;  %s791_s27 = scalar_lea.hbm %s1709_s5, %s1520_s10  ;;  %s297_s25 = scalar_lea.vmem [#allocation10], %s1509_s7 }
 0x1be   : > { %v693_v28 = vsel %vm349_vm1, %v692_v25, %v674_v13  ;;  %v704_v29 = vrot.slane %v691_v24, 4  ;;  %v707_v30 = vsel %vm349_vm1, %v691_v24, %v706_v22  ;;  %s1656_s26 = sshll.u32 %s791_s27, 4  ;;  %s792_s28 = sshll.u32 %s297_s25, 4  ;;  %s793_s28 = int_to_ptr.vmem [resolvable:$true] %s792_s28  ;;  %s795_s26 = int_to_ptr.hbm [resolvable:$true] %s1656_s26 }
 0x1bf   : > { %v699_v31 = vperm.slane %v693_v28, %v1474_v23  ;;  %v715_v32 = vperm.slane %v707_v30, %v1474_v23  ;;  %v722_v33 = vrot.slane %v703_v27, 4  ;;  %s1238_s10 = sshra.s32 %s795_s26, 4  ;;  %s1244_s29 = scalar_lea.hbm %s1709_s5, 32  ;;  %s1239_s10 = int_to_ptr.hbm [resolvable:$true] %s1238_s10 }
 0x1c0   : > { %v705_v34 = vsel %vm349_vm1, %v704_v29, %v685_v17  ;;  %s1240_s7 = scalar_lea.hbm %s1239_s10, 16  ;;  %p1245_p13 = scmp.lt.s32.totalorder %s1239_s10, %s1709_s5 }
 0x1c1   : > { %v711_v16 = vperm.slane %v705_v34, %v1474_v23  ;;  %v718_v35 = vrot.slane %v699_v31, 4  ;;  %v720_v36 = vrot.slane %v715_v32, 4  ;;  %v723_v37 = vsel %vm349_vm1, %v715_v32, %v722_v33  ;;  %p1241_p10 = scmp.ne.s32.totalorder %s1239_s10, %s1240_s7  ;;  %p1246_p0 = scmp.lt.s32.totalorder %s1244_s29, %s1240_s7 }
 0x1c2   : > { %v727_v38 = vpack.c.bf16 %v723_v37, %v723_v37 }
 0x1c3   : > { %v716_v39 = vrot.slane %v711_v16, 4  ;;  %v719_v40 = vsel %vm349_vm1, %v711_v16, %v718_v35  ;;  %v721_v41 = vsel %vm349_vm1, %v720_v36, %v703_v27  ;;  %p1242_p11 = pnand %p1241_p10, %p1430_p4  ;;  %p1247_p2 = por %p1246_p0, %p1245_p13 }
 0x1c4   : > { %v725_v42 = vpack.c.bf16 %v719_v40, %v719_v40  ;;  %v726_v43 = vpack.c.bf16 %v721_v41, %v721_v41  ;;  %731 = vst.msk [vmem:[%s297_s25 + $0xc] sm:$0xf] %vm467_vm2, %v727_v38 }
 0x1c5   : > { %v717_v23 = vsel %vm349_vm1, %v716_v39, %v699_v31  ;;  %p1243_p12 = pneg %p1242_p11 }
 0x1c6   : > { %v724_v44 = vpack.c.bf16 %v717_v23, %v717_v23  ;;  %729 = vst.msk [vmem:[%s297_s25 + $0x4] sm:$0xf] %vm467_vm2, %v725_v42 }
 0x1c7   : > { %730 = vst.msk [vmem:[%s297_s25 + $0x8] sm:$0xf] %vm467_vm2, %v726_v43  ;;  %p1248_p5 = pnand %p1247_p2, %p1243_p12 }
 0x1c8   : > { %728 = vst.msk [vmem:[%s297_s25] sm:$0xf] %vm467_vm2, %v724_v44 }
 0x1c9   : > { %1251 = shalt.err (!%p1248_p5)
}
 0x1ca   : > { %1002 = dma.vmem_to_hbm [thread:$0]  (%p1430_p4), %s793_s28, 256, %s795_s26, %s1624_s11, %s1722_s13, %s1722_s13, %s1326_s8  }
 0x1cb PF: > { %s809_s0 = sand.u32 1, %s1294_s18   ;;  %p1015_p8 = pnand %p960_p6, %p1438_p7 }
 0x1cc   : > { %s810_s1 = scalar_lea.sflag [#allocation4], %s809_s0 }
 0x1cd   : > { %p1016_p1 = pneg %p1015_p8 }
 0x1cf   : > { %1285 = dma.done.wait (%p1016_p1), %s810_s1, 256  }
 0x1d0   : > { %1287 = vsyncadd (%p1016_p1), %s810_s1, 4294967040  ;;  %s1723_s24 = sadd.s32 4294967294, %s1314_s23  }
 0x1d1   : > { %s819_s14 = sand.u32 1, %s1723_s24  }
 0x1d2   : > { %s820_s30 = scalar_lea.sflag [#allocation9], %s819_s14 }
 0x1d3   : > { %1289 = dma.done.wait (%p1016_p1), %s820_s30, 512  }
 0x1d4   : > { %1291 = vsyncadd (%p1016_p1), %s820_s30, 4294966784  ;;  %s26_s23 = sadd.s32 1, %s1314_s23   ;;  %s1724_s18 = smov %s1298_s19 }
 0x1d5   : > { %p23_p4 = scmp.ge.s32.totalorder %s26_s23, 4   ;;  %s1725_s19 = smov %s1302_s20 }
 0x1d6   : > { %s1726_s20 = smov %s1436_s15  ;;  %s1727_s21 = smov %s1310_s22 }
 0x1d7   : > { %s1728_s22 = smov %s1730_s9  ;;  %25 = sbr.rel (!%p23_p4) target bundleno = 12 (0xc), region = 113 }
 0x1dc   :  { %836 = vsyncpa [#allocation3], 1 }
 0x1dd   :  { %838 = vsyncpa [#allocation3 + $0x1], 1 }
 0x1de   :  { %839 = vsyncpa [#allocation6], 1 }
 0x1df   :  { %840 = vsyncpa [#allocation4], 1 }
 0x1e0   :  { %842 = vsyncpa [#allocation4 + $0x1], 1 }
 0x1e1   :  { %843 = vsyncpa [#allocation9], 1 }
 0x1e2   :  { %845 = vsyncpa [#allocation9 + $0x1], 1 }

</bundles_post_ra>
